<compile_context>
chip_gen: v5e
topology: v5e:2x2
jax: 0.10.0
libtpu: 0.0.40
codegen_flags: <defaults>
</compile_context>

<pallas_src>
import functools

import jax
import jax.numpy as jnp
from jax import lax
from jax.experimental import pallas as pl
from jax.experimental.pallas import tpu as pltpu


# ----------------------------- Pallas kernels -------------------------------


def _vmem():
    return pl.BlockSpec(memory_space=pltpu.MemorySpace.VMEM)


def _obs_contrib(obs, w_obs):
    """obs @ w_obs, computed on the VPU as broadcast FMAs when obs_dim is tiny.

    A contraction depth of 2 wastes an entire MXU push/pop (and on v5e/v6e its
    result-FIFO drain sits on the serial recurrence path); broadcast FMAs use a
    different VLIW slot and overlap with the H x H recurrence matmul.
    """
    obs_dim = obs.shape[1]
    if obs_dim <= 8:
        acc = obs[:, 0:1] * w_obs[0:1, :]
        for d in range(1, obs_dim):
            acc = acc + obs[:, d:d + 1] * w_obs[d:d + 1, :]
        return acc
    return jnp.dot(obs, w_obs, preferred_element_type=jnp.float32)


def _rnn_step_kernel(obs_ref, h_ref, w_obs_ref, w_h_ref, b_ih_ref,
                     w_comb_ref, b_comb_ref, packed_ref):
    """One RecognitionRNN step, fully fused, lane-dense packed output.

    obs_ref : (B, obs_dim)   w_obs_ref : (obs_dim, H)   (i2h weight, obs part, transposed)
    h_ref   : (B, H)         w_h_ref   : (H, H)         (i2h weight, hidden part, transposed)
    b_ih_ref: (1, H)         w_comb_ref: (H, P)  = [w_ho^T | I_H | 0],  b_comb_ref: (1, P)
    packed_ref: (B, P)  ->  [:, :out_dim] = h2o(h_new),  [:, out_dim:out_dim+H] = h_new
    """
    h_new = jnp.tanh(
        _obs_contrib(obs_ref[...], w_obs_ref[...])
        + jnp.dot(h_ref[...], w_h_ref[...], preferred_element_type=jnp.float32)
        + b_ih_ref[...])
    packed_ref[...] = (
        jnp.dot(h_new, w_comb_ref[...], preferred_element_type=jnp.float32)
        + b_comb_ref[...])


def _rnn_encode_kernel(x_ref, w_obs_ref, w_h_ref, b_ih_ref,
                       w_comb_ref, b_comb_ref, packed_ref):
    """Full reverse-time trajectory encoding in one kernel invocation (no grid).

    x_ref : (T, B, obs_dim) whole trajectory, resident in VMEM.
    Hidden state is carried as a fori_loop value (stays in vregs); the fused
    h2o readout + final-hidden write is a single lane-dense (B, P) store.
    """
    T, B, _ = x_ref.shape
    H = w_h_ref.shape[0]

    # Hoisted out of the time loop: single load/broadcast of the weights/bias.
    w_obs = w_obs_ref[...]
    w_h = w_h_ref[...]
    b_ih = b_ih_ref[...]

    def body(t, h):
        obs = x_ref[T - 1 - t]                      # reverse-time step
        return jnp.tanh(
            _obs_contrib(obs, w_obs)
            + jnp.dot(h, w_h, preferred_element_type=jnp.float32)
            + b_ih)

    h0 = jnp.zeros((B, H), jnp.float32)             # RecognitionRNN.initHidden()
    h_final = lax.fori_loop(0, T, body, h0, unroll=True if T <= 64 else 8)

    packed_ref[...] = (
        jnp.dot(h_final, w_comb_ref[...], preferred_element_type=jnp.float32)
        + b_comb_ref[...])


# ------------------------------ wrappers -------------------------------------


def prepare_params(params, obs_dim):
    """Split/transpose/pad PyTorch-layout weights ONCE, outside the call path.

    Returns (prepared_arrays, out_dim).  `w_comb` is the lane-dense combined
    readout [w_ho^T | I_H | 0] of width P (multiple of 128) so the kernel emits
    a single unmasked full-width store carrying both the output and h_new.
    """
    w_ih = jnp.asarray(params["w_ih"], jnp.float32)   # (H, obs+H)
    b_ih = jnp.asarray(params["b_ih"], jnp.float32)   # (H,)
    w_ho = jnp.asarray(params["w_ho"], jnp.float32)   # (2L, H)
    b_ho = jnp.asarray(params["b_ho"], jnp.float32)   # (2L,)
    H = int(w_ih.shape[0])
    out_dim = int(w_ho.shape[0])
    P = max(128, ((out_dim + H + 127) // 128) * 128)

    w_comb = jnp.zeros((H, P), jnp.float32)
    w_comb = w_comb.at[:, :out_dim].set(w_ho.T)
    w_comb = w_comb.at[:, out_dim:out_dim + H].set(jnp.eye(H, dtype=jnp.float32))
    b_comb = jnp.zeros((P,), jnp.float32).at[:out_dim].set(b_ho)

    prepared = dict(
        w_obs_t=w_ih[:, :obs_dim].T,     # (obs_dim, H)
        w_h_t=w_ih[:, obs_dim:].T,       # (H, H)
        b_ih=b_ih[None, :],              # (1, H)
        w_comb=w_comb,                   # (H, P)
        b_comb=b_comb[None, :],          # (1, P)
    )
    return prepared, out_dim


@functools.partial(jax.jit, static_argnames=("out_dim",))
def recognition_rnn_step(prepared, observation, hidden_state, *, out_dim):
    """Exactly RecognitionRNN.forward(observation, hidden_state)."""
    B = observation.shape[0]
    H = prepared["w_h_t"].shape[0]
    P = prepared["w_comb"].shape[1]
    packed = pl.pallas_call(
        _rnn_step_kernel,
        out_shape=jax.ShapeDtypeStruct((B, P), jnp.float32),
        in_specs=[_vmem()] * 7,
        out_specs=_vmem(),
    )(observation, hidden_state, prepared["w_obs_t"], prepared["w_h_t"],
      prepared["b_ih"], prepared["w_comb"], prepared["b_comb"])
    return packed[:, :out_dim], packed[:, out_dim:out_dim + H]


@functools.partial(jax.jit, static_argnames=("out_dim",))
def recognition_rnn_encode(prepared, trajectory, *, out_dim):
    """Encode a full trajectory in reverse time order (the module's intended use)
    in a single grid-less pallas_call: the trajectory, weights and hidden state all
    stay on-chip, the recurrence runs in an in-kernel fori_loop, and the readout is
    one lane-dense store."""
    B, T, obs_dim = trajectory.shape
    H = prepared["w_h_t"].shape[0]
    P = prepared["w_comb"].shape[1]
    x_tbo = jnp.transpose(trajectory, (1, 0, 2))      # (T, B, obs_dim)
    packed = pl.pallas_call(
        _rnn_encode_kernel,
        out_shape=jax.ShapeDtypeStruct((B, P), jnp.float32),
        in_specs=[_vmem()] * 6,
        out_specs=_vmem(),
    )(x_tbo, prepared["w_obs_t"], prepared["w_h_t"],
      prepared["b_ih"], prepared["w_comb"], prepared["b_comb"])
    return packed[:, :out_dim], packed[:, out_dim:out_dim + H]


# ------------------------- pure-JAX reference --------------------------------


def _step_ref(params, obs, h):
    combined = jnp.concatenate([obs, h], axis=1)
    h_new = jnp.tanh(combined @ params["w_ih"].T + params["b_ih"])
    out = h_new @ params["w_ho"].T + params["b_ho"]
    return out, h_new


def _encode_ref(params, trajectory):
    B, T, _ = trajectory.shape
    H = params["w_ih"].shape[0]
    h = jnp.zeros((B, H), jnp.float32)
    out = jnp.zeros((B, params["w_ho"].shape[0]), jnp.float32)
    for t in reversed(range(T)):
        out, h = _step_ref(params, trajectory[:, t, :], h)
    return out, h


# ---------------------------------- main --------------------------------------


if __name__ == "__main__":
    B = 2            # batch
    OBS = 2          # obs_dim
    H = 25           # hidden_size
    LAT = 4          # latent_dim  (output dim = 2 * LAT)
    T = 8            # trajectory length for the fused reverse-scan kernel

    key = jax.random.PRNGKey(0)
    k1, k2, k3, k4, k5, k6 = jax.random.split(key, 6)

    # PyTorch-layout parameters: i2h (H, OBS+H), h2o (2*LAT, H).
    params = dict(
        w_ih=0.2 * jax.random.normal(k1, (H, OBS + H), jnp.float32),
        b_ih=0.1 * jax.random.normal(k2, (H,), jnp.float32),
        w_ho=0.2 * jax.random.normal(k3, (2 * LAT, H), jnp.float32),
        b_ho=0.1 * jax.random.normal(k4, (2 * LAT,), jnp.float32),
    )

    observation = jax.random.normal(k5, (B, OBS), jnp.float32)
    hidden0 = jnp.zeros((B, H), jnp.float32)                 # initHidden()
    trajectory = jax.random.normal(k6, (B, T, OBS), jnp.float32)

    # One-time weight preparation (outside every call path).
    prepared, out_dim = prepare_params(params, OBS)

    # --- single-step forward (exact module semantics) ---
    out, h_new = recognition_rnn_step(prepared, observation, hidden0, out_dim=out_dim)
    out, h_new = jax.block_until_ready((out, h_new))
    assert out.shape == (B, 2 * LAT) and h_new.shape == (B, H)
    out_ref, h_ref = _step_ref(params, observation, hidden0)
    assert bool(jnp.allclose(out, out_ref, atol=2e-3, rtol=2e-3))
    assert bool(jnp.allclose(h_new, h_ref, atol=2e-3, rtol=2e-3))

    # --- fused reverse-order trajectory encoding (one grid-less pallas_call) ---
    enc_out, enc_h = recognition_rnn_encode(prepared, trajectory, out_dim=out_dim)
    enc_out, enc_h = jax.block_until_ready((enc_out, enc_h))
    assert enc_out.shape == (B, 2 * LAT) and enc_h.shape == (B, H)
    enc_out_ref, enc_h_ref = _encode_ref(params, trajectory)
    assert bool(jnp.allclose(enc_out, enc_out_ref, atol=2e-3, rtol=2e-3))
    assert bool(jnp.allclose(enc_h, enc_h_ref, atol=2e-3, rtol=2e-3))

    assert bool(jnp.all(jnp.isfinite(enc_out)))
    print("KERNEL_OK")
</pallas_src>

<mosaic_0001>
module attributes {stable_mosaic.version = 11 : i64} {
  func.func @_rnn_step_kernel(%arg0: memref<2x2xf32, #tpu.memory_space<vmem>>, %arg1: memref<2x25xf32, #tpu.memory_space<vmem>>, %arg2: memref<2x25xf32, #tpu.memory_space<vmem>>, %arg3: memref<25x25xf32, #tpu.memory_space<vmem>>, %arg4: memref<1x25xf32, #tpu.memory_space<vmem>>, %arg5: memref<25x128xf32, #tpu.memory_space<vmem>>, %arg6: memref<1x128xf32, #tpu.memory_space<vmem>>, %arg7: memref<2x128xf32, #tpu.memory_space<vmem>>) attributes {dimension_semantics = [], scalar_prefetch = 0 : i64, scratch_operands = 0 : i64, tpu.core_type = #tpu.core_type<tc>} {
    %c0 = arith.constant 0 : index
    %c0_0 = arith.constant 0 : index
    %0 = vector.load %arg0[%c0, %c0_0] : memref<2x2xf32, #tpu.memory_space<vmem>>, vector<2x2xf32>
    %c0_1 = arith.constant 0 : index
    %c0_2 = arith.constant 0 : index
    %1 = vector.load %arg2[%c0_1, %c0_2] : memref<2x25xf32, #tpu.memory_space<vmem>>, vector<2x25xf32>
    %2 = vector.extract_strided_slice %0 {offsets = [0, 0], sizes = [2, 1], strides = [1, 1]} : vector<2x2xf32> to vector<2x1xf32>
    %3 = vector.extract_strided_slice %1 {offsets = [0, 0], sizes = [1, 25], strides = [1, 1]} : vector<2x25xf32> to vector<1x25xf32>
    %4 = vector.broadcast %2 : vector<2x1xf32> to vector<2x25xf32>
    %5 = vector.broadcast %3 : vector<1x25xf32> to vector<2x25xf32>
    %6 = arith.mulf %4, %5 : vector<2x25xf32>
    %7 = vector.extract_strided_slice %0 {offsets = [0, 1], sizes = [2, 1], strides = [1, 1]} : vector<2x2xf32> to vector<2x1xf32>
    %8 = vector.extract_strided_slice %1 {offsets = [1, 0], sizes = [1, 25], strides = [1, 1]} : vector<2x25xf32> to vector<1x25xf32>
    %9 = vector.broadcast %7 : vector<2x1xf32> to vector<2x25xf32>
    %10 = vector.broadcast %8 : vector<1x25xf32> to vector<2x25xf32>
    %11 = arith.mulf %9, %10 : vector<2x25xf32>
    %12 = arith.addf %6, %11 : vector<2x25xf32>
    %c0_3 = arith.constant 0 : index
    %c0_4 = arith.constant 0 : index
    %13 = vector.load %arg1[%c0_3, %c0_4] : memref<2x25xf32, #tpu.memory_space<vmem>>, vector<2x25xf32>
    %c0_5 = arith.constant 0 : index
    %c0_6 = arith.constant 0 : index
    %14 = vector.load %arg3[%c0_5, %c0_6] : memref<25x25xf32, #tpu.memory_space<vmem>>, vector<25x25xf32>
    %cst = arith.constant dense<0.000000e+00> : vector<2x25xf32>
    %15 = tpu.matmul %13, %14, %cst {dimension_numbers = #tpu.dot_dimension_numbers<[1], [0], [0], [1], [0, 0, 1, 1], [], []>} : vector<2x25xf32>, vector<25x25xf32>, vector<2x25xf32> -> vector<2x25xf32>
    %16 = arith.addf %12, %15 : vector<2x25xf32>
    %c0_7 = arith.constant 0 : index
    %c0_8 = arith.constant 0 : index
    %17 = vector.load %arg4[%c0_7, %c0_8] : memref<1x25xf32, #tpu.memory_space<vmem>>, vector<1x25xf32>
    %18 = vector.broadcast %17 : vector<1x25xf32> to vector<2x25xf32>
    %19 = arith.addf %16, %18 : vector<2x25xf32>
    %20 = math.tanh %19 : vector<2x25xf32>
    %c0_9 = arith.constant 0 : index
    %c0_10 = arith.constant 0 : index
    %21 = vector.load %arg5[%c0_9, %c0_10] : memref<25x128xf32, #tpu.memory_space<vmem>>, vector<25x128xf32>
    %cst_11 = arith.constant dense<0.000000e+00> : vector<2x128xf32>
    %22 = tpu.matmul %20, %21, %cst_11 {dimension_numbers = #tpu.dot_dimension_numbers<[1], [0], [0], [1], [0, 0, 1, 1], [], []>} : vector<2x25xf32>, vector<25x128xf32>, vector<2x128xf32> -> vector<2x128xf32>
    %c0_12 = arith.constant 0 : index
    %c0_13 = arith.constant 0 : index
    %23 = vector.load %arg6[%c0_12, %c0_13] : memref<1x128xf32, #tpu.memory_space<vmem>>, vector<1x128xf32>
    %24 = vector.broadcast %23 : vector<1x128xf32> to vector<2x128xf32>
    %25 = arith.addf %22, %24 : vector<2x128xf32>
    %c0_14 = arith.constant 0 : index
    %c0_15 = arith.constant 0 : index
    %26 = vector.load %arg7[%c0_14, %c0_15] : memref<2x128xf32, #tpu.memory_space<vmem>>, vector<2x128xf32>
    tpu.vector_store %arg7[%c0_14, %c0_15], %25 {strides = array<i32>} : memref<2x128xf32, #tpu.memory_space<vmem>>, vector<2x128xf32>,
    return
  }
}

</mosaic_0001>

<bundles_post_ra>
// kernel: recognition_rnn_step.1
= control target key start
LH: loop header
LB: loop body
LE: loop exit
PB: predicated region body
PF: predicated region fallthrough
CT: control target
= control target key end

     0   :  { %12 = vsyncpa [#allocation3], 0  ;;  %s418_s0 = inlined_call_operand.vmem [shape: f32[2,2], index: 0, kind: input, shape index: {}]   ;;  %s419_s1 = inlined_call_operand.vmem [shape: f32[2,25], index: 1, kind: input, shape index: {}]   ;;  %s420_s2 = inlined_call_operand.hbm [shape: f32[2,25], index: 2, kind: input, shape index: {}]   ;;  %s421_s3 = inlined_call_operand.hbm [shape: f32[25,25], index: 3, kind: input, shape index: {}]   ;;  %s422_s4 = inlined_call_operand.hbm [shape: f32[1,25], index: 4, kind: input, shape index: {}]   ;;  %s423_s5 = inlined_call_operand.hbm [shape: f32[25,128], index: 5, kind: input, shape index: {}]   ;;  %s424_s6 = inlined_call_operand.hbm [shape: f32[1,128], index: 6, kind: input, shape index: {}]   ;;  %s425_s7 = inlined_call_operand.vmem [shape: f32[2,128], index: 7, kind: output, shape index: {}]  }
   0x1   :  { %13 = vsyncpa [#allocation5], 0  ;;  %s34_s26 = sshll.u32 %s421_s3, 4  ;;  %s35_s26 = int_to_ptr.hbm [resolvable:$true] %s34_s26 }
   0x2   :  { %14 = vsyncpa [#allocation8], 0  ;;  %s341_s27 = smov [#allocation4]   ;;  %s58_s8 = sshll.u32 %s423_s5, 4  ;;  %s59_s8 = int_to_ptr.hbm [resolvable:$true] %s58_s8 }
   0x3   :  { %s36_s28 = sshll.u32 %s341_s27, 4  ;;  %s342_s9 = smov 128   ;;  %s37_s28 = int_to_ptr.vmem [resolvable:$true] %s36_s28 }
   0x4   :  { %s343_s10 = smov 8   ;;  %s344_s11 = smov [#allocation7]  }
   0x5   :  { %42 = dma.hbm_to_vmem [thread:$0]  %s35_s26, 512, %s37_s28, [#allocation5], %s342_s9, %s342_s9, %s343_s10  }
   0x6   :  { %s60_s12 = sshll.u32 %s344_s11, 4  ;;  %s24_s15 = sshll.u32 %s420_s2, 4  ;;  %s61_s12 = int_to_ptr.vmem [resolvable:$true] %s60_s12  ;;  %s25_s15 = int_to_ptr.hbm [resolvable:$true] %s24_s15 }
   0x7   :  { %66 = dma.hbm_to_vmem [thread:$0]  %s59_s8, 512, %s61_s12, [#allocation8], %s342_s9, %s342_s9, %s343_s10  }
   0x8   :  { %s48_s17 = sshll.u32 %s422_s4, 4  ;;  %s345_s18 = smov [#allocation2]   ;;  %s49_s17 = int_to_ptr.hbm [resolvable:$true] %s48_s17 }
   0x9   :  { %s26_s19 = sshll.u32 %s345_s18, 4  ;;  %s346_s5 = smov [#allocation6]   ;;  %s27_s19 = int_to_ptr.vmem [resolvable:$true] %s26_s19 }
   0xa   :  { %29 = dma.hbm_to_vmem [thread:$0]  %s25_s15, 32, %s27_s19, [#allocation3]  }
   0xb   :  { %s50_s20 = sshll.u32 %s346_s5, 4  ;;  %s72_s23 = sshll.u32 %s424_s6, 4  ;;  %s51_s20 = int_to_ptr.vmem [resolvable:$true] %s50_s20  ;;  %s73_s23 = int_to_ptr.hbm [resolvable:$true] %s72_s23 }
   0xc   :  { %53 = dma.hbm_to_vmem [thread:$0]  %s49_s17, 16, %s51_s20, [#allocation5]  }
   0xd   :  { %s347_s2 = smov [#allocation9]  }
   0xe   :  { %s74_s24 = sshll.u32 %s347_s2, 4  ;;  %s75_s24 = int_to_ptr.vmem [resolvable:$true] %s74_s24 }
   0xf   :  { %77 = dma.hbm_to_vmem [thread:$0]  %s73_s23, 16, %s75_s24, [#allocation8]  }
  0x10   :  { %335 = dma.done.wait [#allocation3], 32  }
  0x11   :  { %336 = vsyncadd [#allocation3], 4294967264 }
  0x12   :  { %337 = dma.done.wait [#allocation5], 528  }
  0x13   :  { %338 = vsyncadd [#allocation5], 4294966768 }
  0x14   :  { %339 = dma.done.wait [#allocation8], 528  }
  0x15   :  { %340 = vsyncadd [#allocation8], 4294966768  ;;  %v348_v0 = vmov 0   ;;  %vm123_vm0 = vcmask 1040384   ;;  %v118_v1 = vld [vmem:[#allocation4 + $0x18] sm:$0x1] }
  0x16   :  { %209 = vset.pattern.permute.xlu0 %v348_v0  ;;  %v98_v2 = vld [vmem:[%s418_s0] sm:$0x3]  ;;  %v117_v3 = vld [vmem:[#allocation4 + $0x10] sm:$0xff]  ;;  %196 = vmatpush.msk.msra.mxu0 %vm123_vm0, %v118_v1  ;;  %v116_v4 = vld [vmem:[#allocation4 + $0x8] sm:$0xff]  ;;  %vm119_vm1 = vcmask 203776   ;;  %v349_v7 = vmov 1  }
  0x17   :  { %102 = vperm.xlu0 %209, %v98_v2   ;;  %v115_v5 = vld [vmem:[#allocation4] sm:$0xff]  ;;  %v114_v6 = vld [vmem:[%s419_s1] sm:$0x3]  ;;  %v157_v8 = vld [vmem:[#allocation7 + $0x18] sm:$0x1] }
  0x18   :  { %140 = vmatpush.msra.mxu0 %v117_v3  ;;  %198 = vmatpush.msk.msra.mxu1 %vm123_vm0, %v157_v8  ;;  %v156_v9 = vld [vmem:[#allocation7 + $0x10] sm:$0xff]  ;;  %v155_v10 = vld [vmem:[#allocation7 + $0x8] sm:$0xff]  ;;  %v154_v11 = vld [vmem:[#allocation7] sm:$0xff] }
  0x19   :  { %v99_v13 = vld [vmem:[#allocation2] sm:$0x3]  ;;  %v211_v20 = vld [vmem:[#allocation6] ss:$0 sm:$0xff]  ;;  %v212_v25 = vld [vmem:[#allocation9] ss:$0 sm:$0xff] }
  0x1a   :  { %141 = vmatpush.msra.mxu0 %v116_v4  ;;  %181 = vmatpush.msra.mxu1 %v156_v9  ;;  %v111_v14 = vperm.slane %v99_v13, 1  ;;  %v105_v16 = vperm.slane %v99_v13, 0 }
  0x1c   :  { %142 = vmatpush.msra.mxu0 %v115_v5  ;;  %182 = vmatpush.msra.mxu1 %v155_v10 }
  0x1d   :  { %197 = vmatmul.msk.f32.vlgmr.msra.gmra.mxu0 %vm119_vm1, %v114_v6 }
  0x1e   :  { %183 = vmatpush.msra.mxu1 %v154_v11 }
  0x1f   :  { %210 = vset.pattern.permute.xlu0 %v349_v7 }
  0x20   :  { %108 = vperm.xlu0 %210, %v98_v2  }
  0x89   :  { %v103_v12 = vpop.permute.xlu0 %102 }
  0x8a   :  { %v106_v18 = vmul.f32 %v105_v16, %v103_v12 }
  0x92   :  { %v109_v15 = vpop.permute.xlu0 %108 }
  0x93   :  { %v112_v17 = vmul.f32 %v111_v14, %v109_v15 }
  0x95   :  { %v113_v19 = vadd.f32 %v112_v17, %v106_v18 }
  0x9a   :  { %v144_v21 = vpop.f32.mrf.mxu0 }
  0x9b   :  { %v147_v22 = vadd.f32 %v144_v21, %v113_v19 }
  0x9d   :  { %v152_v23 = vadd.f32 %v211_v20, %v147_v22 }
  0x9f   :  { %213 = vtanh.f32 %v152_v23 }
  0xa5   :  { %v214_v24 = vpop.eup %213 }
  0xa6   :  { %199 = vmatmul.msk.f32.vlgmr.msra.gmra.mxu1 %vm119_vm1, %v214_v24 }
 0x123   :  { %v185_v26 = vpop.f32.mrf.mxu1 }
 0x124   :  { %v186_v27 = vadd.f32 %v212_v25, %v185_v26 }
 0x126   :  { %188 = vst [vmem:[%s425_s7] sm:$0x3] %v186_v27 }
 0x127   :  { %193 = vsyncpa [#allocation3], 1 }
 0x128   :  { %194 = vsyncpa [#allocation5], 1 }
 0x129   :  { %195 = vsyncpa [#allocation8], 1 }

</bundles_post_ra>
